<compile_context>
chip_gen: v5e
topology: v5e:2x2
jax: 0.10.0
libtpu: 0.0.40
codegen_flags: <defaults>
</compile_context>

<pallas_src>
import math

import numpy as np
import jax
import jax.numpy as jnp
from jax.experimental import pallas as pl
from jax.experimental.pallas import tpu as pltpu

_LANE = 128  # lane width / halo width; kernel_size - 1 must fit in one halo block


def kaiser_sinc_filter1d(cutoff, half_width, kernel_size):
    """NumPy port of the PyTorch helper. Returns a (kernel_size,) float32 array."""
    even = kernel_size % 2 == 0
    half_size = kernel_size // 2
    delta_f = 4 * half_width
    A = 2.285 * (half_size - 1) * math.pi * delta_f + 7.95
    if A > 50.0:
        beta = 0.1102 * (A - 8.7)
    elif A >= 21.0:
        beta = 0.5842 * (A - 21) ** 0.4 + 0.07886 * (A - 21.0)
    else:
        beta = 0.0
    window = np.kaiser(kernel_size, beta)  # == torch.kaiser_window(periodic=False)
    if even:
        time = np.arange(-half_size, half_size) + 0.5
    else:
        time = np.arange(kernel_size) - half_size
    if cutoff == 0:
        filter_ = np.zeros_like(time)
    else:
        filter_ = 2 * cutoff * window * np.sinc(2 * cutoff * time)
        filter_ = filter_ / filter_.sum()
    return filter_.astype(np.float32)


def _round_up(x, m):
    return (x + m - 1) // m * m


def _banded_weight(taps, pad_total):
    """(256, 128) banded Toeplitz: out[:, o] = sum_k taps[k] * slab[:, 128 - pad + o + k]."""
    K = len(taps)
    offset = _LANE - pad_total
    assert 0 <= offset and offset + (_LANE - 1) + (K - 1) < 2 * _LANE
    w = np.zeros((2 * _LANE, _LANE), np.float32)
    for o in range(_LANE):
        for k in range(K):
            w[offset + o + k, o] = float(taps[k])
    return w


def _lpf_kernel_factory(tt, t_len, lhs_dtype, precision):
    nb = tt // _LANE                       # 128-lane output column blocks per tile
    need_lane_mask = (t_len % tt) != 0     # only the ragged last time tile has garbage lanes

    def kernel(x_ref, halo_ref, w_ref, o_ref):
        # x_ref: (TR, TT) main tile; halo_ref: (TR, 128) left context (tile j-1's last 128
        # lanes, clamped to block 0 at j == 0); w_ref: (256, 128) banded taps; o_ref: (TR, TT).
        j = pl.program_id(1)
        w = w_ref[...]

        x = x_ref[...]
        if need_lane_mask:
            # Zero out-of-range lanes of the last (partial) tile: the 256-deep MXU
            # contraction touches every lane, and 0 * uninitialized could be NaN.
            lane = jax.lax.broadcasted_iota(jnp.int32, (1, tt), 1)
            x = jnp.where(j * tt + lane < t_len, x, jnp.zeros_like(x))
        x = x.astype(lhs_dtype)

        h = halo_ref[...]
        # Causal zero left-pad: at the first time tile the left context is all zeros.
        h = jnp.where(j == 0, jnp.zeros_like(h), h).astype(lhs_dtype)

        def out_block(slab):
            return jnp.dot(slab, w, preferred_element_type=jnp.float32,
                           precision=precision).astype(o_ref.dtype)

        # First output column block needs the left halo.
        o_ref[:, 0:_LANE] = out_block(jnp.concatenate([h, x[:, 0:_LANE]], axis=-1))
        # Remaining blocks: lane-aligned 256-wide slabs of the main tile, one MXU matmul each.
        for c in range(1, nb):
            slab = x[:, (c - 1) * _LANE:(c + 1) * _LANE]
            o_ref[:, c * _LANE:(c + 1) * _LANE] = out_block(slab)

    return kernel


def low_pass_filter1d(x, *, cutoff=0.5, half_width=0.6, stride=1, padding=True,
                      kernel_size=12, time_tile=2048, row_tile=512):
    """Causal Kaiser-windowed-sinc low-pass filter == LowPassFilter1d.forward. x: (B, C, T)."""
    if stride != 1:
        # TODO(synk): strided (downsampling) depthwise conv variant not implemented.
        raise NotImplementedError("only stride=1 (the module default) is supported")
    B, C, T = x.shape
    K = kernel_size
    assert 2 <= K <= _LANE, "kernel_size must fit inside the 128-lane halo block"

    taps = kaiser_sinc_filter1d(cutoff, half_width, K)
    even = K % 2 == 0
    pad_left = K // 2 - int(even)
    pad_right = K // 2
    pad_total = pad_left + pad_right          # == K - 1 for the causal zero-pad

    if not padding and T < K:
        raise ValueError("padding=False requires T >= kernel_size")

    n_rows = B * C
    # The kernel always computes the causal-padded output (length T); padding=False is the
    # same sequence with the first pad_total samples dropped (non-default path).
    t_out = T

    if x.dtype == jnp.bfloat16:
        lhs_dtype, sub, precision = jnp.bfloat16, 16, None          # native bf16 MXU LHS
    else:
        lhs_dtype, sub, precision = jnp.float32, 8, jax.lax.Precision.HIGHEST

    # Lane-dense time tiles (multiple of 128) and sublane-dense row tiles.
    time_tile = max(_LANE, (time_tile // _LANE) * _LANE)
    tt = min(time_tile, _round_up(t_out, _LANE))
    n_t = pl.cdiv(t_out, tt)
    bpt = tt // _LANE

    row_tile = max(sub, (row_tile // sub) * sub)
    tr = min(row_tile, _round_up(n_rows, sub))
    n_r = pl.cdiv(n_rows, tr)
    if n_r == 1 and n_t == 1 and n_rows > sub:
        # Expose >= 2 parallel grid steps so both v7x TensorCores get work on small inputs.
        tr = _round_up(pl.cdiv(n_rows, 2), sub)
        n_r = pl.cdiv(n_rows, tr)
    assert tt % _LANE == 0 and tr % sub == 0

    xr = x.reshape(n_rows, T)                 # free reshape; no host-side jnp.pad copies
    w_arr = jnp.asarray(_banded_weight(taps, pad_total), dtype=lhs_dtype)

    kernel = _lpf_kernel_factory(tt, T, lhs_dtype, precision)

    itemsize = 2 if x.dtype == jnp.bfloat16 else 4
    cost = pl.CostEstimate(
        flops=2 * K * n_rows * t_out,
        transcendentals=0,
        bytes_accessed=itemsize * (n_rows * T                 # main input
                                   + n_r * n_t * tr * _LANE   # halo re-reads
                                   + n_rows * t_out)          # output
                       + 2 * _LANE * _LANE * itemsize,        # banded taps
    )

    out = pl.pallas_call(
        kernel,
        out_shape=jax.ShapeDtypeStruct((n_rows, t_out), x.dtype),
        grid_spec=pltpu.PrefetchScalarGridSpec(
            num_scalar_prefetch=0,
            grid=(n_r, n_t),
            in_specs=[
                # Main (TR, TT) tile.
                pl.BlockSpec((tr, tt), lambda i, j: (i, j)),
                # 128-lane left halo: the 128-block just before this tile (clamped at j == 0;
                # the kernel zeroes it there to realize the causal zero left-pad).
                pl.BlockSpec((tr, _LANE),
                             lambda i, j: (i, jnp.maximum(j * bpt - 1, 0))),
                # Banded Toeplitz taps; block index never changes -> fetched once.
                pl.BlockSpec((2 * _LANE, _LANE), lambda i, j: (0, 0)),
            ],
            out_specs=pl.BlockSpec((tr, tt), lambda i, j: (i, j)),
        ),
        compiler_params=pltpu.CompilerParams(
            dimension_semantics=("parallel", "parallel"),
            vmem_limit_bytes=48 * 1024 * 1024,
        ),
        cost_estimate=cost,
    )(xr, xr, w_arr)

    if not padding:
        out = out[:, pad_total:]              # non-default path; small extra copy
    return out.reshape(B, C, out.shape[-1])


def low_pass_filter1d_ref(x, *, cutoff=0.5, half_width=0.6, padding=True, kernel_size=12):
    """Pure-JAX reference (direct translation of the causal-padded depthwise conv1d)."""
    filt = jnp.asarray(kaiser_sinc_filter1d(cutoff, half_width, kernel_size))
    K = kernel_size
    even = K % 2 == 0
    pad_left = K // 2 - int(even)
    pad_right = K // 2
    if padding:
        x = jnp.pad(x, ((0, 0), (0, 0), (pad_left + pad_right, 0)))
    t_out = x.shape[-1] - K + 1
    out = filt[0] * x[..., 0:t_out]
    for k in range(1, K):
        out = out + filt[k] * x[..., k:k + t_out]
    return out


if __name__ == "__main__":
    key = jax.random.PRNGKey(0)

    # 1) Small aligned (B, C, T) waveform-feature input.
    B, C, T = 2, 8, 256
    x = jax.random.normal(key, (B, C, T), dtype=jnp.float32)
    out = jax.block_until_ready(low_pass_filter1d(x))
    expected = low_pass_filter1d_ref(x)
    assert out.shape == expected.shape and out.dtype == x.dtype
    assert jnp.allclose(out, expected, atol=1e-5, rtol=1e-5)

    # 2) Ragged case (exercises partial row/time blocks + in-kernel edge masking).
    B2, C2, T2 = 2, 5, 200
    x2 = jax.random.normal(jax.random.PRNGKey(0), (B2, C2, T2), dtype=jnp.float32)
    out2 = jax.block_until_ready(low_pass_filter1d(x2))
    exp2 = low_pass_filter1d_ref(x2)
    assert out2.shape == exp2.shape
    assert jnp.allclose(out2, exp2, atol=1e-5, rtol=1e-5)

    # 3) Multi-tile time axis (exercises the left-halo BlockSpec across tiles).
    B3, C3, T3 = 1, 4, 300
    x3 = jax.random.normal(jax.random.PRNGKey(0), (B3, C3, T3), dtype=jnp.float32)
    out3 = jax.block_until_ready(low_pass_filter1d(x3, time_tile=128))
    exp3 = low_pass_filter1d_ref(x3)
    assert out3.shape == exp3.shape
    assert jnp.allclose(out3, exp3, atol=1e-5, rtol=1e-5)

    print("KERNEL_OK")
</pallas_src>

<mosaic_0001>
module attributes {stable_mosaic.version = 11 : i64} {
  func.func @kernel(%arg0: i32, %arg1: i32, %arg2: memref<8x256xf32, #tpu.memory_space<vmem>>, %arg3: memref<8x128xf32, #tpu.memory_space<vmem>>, %arg4: memref<256x128xf32, #tpu.memory_space<vmem>>, %arg5: memref<8x256xf32, #tpu.memory_space<vmem>>) attributes {dimension_semantics = [#tpu.dimension_semantics<parallel>, #tpu.dimension_semantics<parallel>], iteration_bounds = array<i64: 2, 1>, scalar_prefetch = 0 : i64, scratch_operands = 0 : i64, tpu.core_type = #tpu.core_type<tc>, window_params = [{transform_indices = @transform_0, window_bounds = array<i64: 8, 256>}, {transform_indices = @transform_1, window_bounds = array<i64: 8, 128>}, {pipeline_mode = #tpu.pipeline_mode<synchronous>, transform_indices = @transform_2, window_bounds = array<i64: 256, 128>}, {transform_indices = @transform_3, window_bounds = array<i64: 8, 256>}]} {
    %c0 = arith.constant 0 : index
    %c0_0 = arith.constant 0 : index
    %0 = vector.load %arg4[%c0, %c0_0] : memref<256x128xf32, #tpu.memory_space<vmem>>, vector<256x128xf32>
    %c0_1 = arith.constant 0 : index
    %c0_2 = arith.constant 0 : index
    %1 = vector.load %arg2[%c0_1, %c0_2] : memref<8x256xf32, #tpu.memory_space<vmem>>, vector<8x256xf32>
    %c0_3 = arith.constant 0 : index
    %c0_4 = arith.constant 0 : index
    %2 = vector.load %arg3[%c0_3, %c0_4] : memref<8x128xf32, #tpu.memory_space<vmem>>, vector<8x128xf32>
    %c0_i32 = arith.constant 0 : i32
    %3 = arith.cmpi eq, %arg1, %c0_i32 : i32
    %cst = arith.constant 0.000000e+00 : f32
    %4 = vector.broadcast %cst : f32 to vector<8x128xf32>
    %5 = arith.select %3, %4, %2 : vector<8x128xf32>
    %6 = vector.extract_strided_slice %1 {offsets = [0, 0], sizes = [8, 128], strides = [1, 1]} : vector<8x256xf32> to vector<8x128xf32>
    %7 = tpu.concatenate %5, %6 in 1 : vector<8x128xf32>, vector<8x128xf32> -> vector<8x256xf32>
    %cst_5 = arith.constant dense<0.000000e+00> : vector<8x128xf32>
    %8 = tpu.matmul %7, %0, %cst_5 {dimension_numbers = #tpu.dot_dimension_numbers<[1], [0], [0], [1], [0, 0, 1, 1], [], []>, precision = #tpu.contract_precision<fp32>} : vector<8x256xf32>, vector<256x128xf32>, vector<8x128xf32> -> vector<8x128xf32>
    %c0_6 = arith.constant 0 : index
    %c0_7 = arith.constant 0 : index
    %9 = vector.load %arg5[%c0_6, %c0_7] : memref<8x256xf32, #tpu.memory_space<vmem>>, vector<8x128xf32>
    tpu.vector_store %arg5[%c0_6, %c0_7], %8 {strides = array<i32>} : memref<8x256xf32, #tpu.memory_space<vmem>>, vector<8x128xf32>,
    %cst_8 = arith.constant dense<0.000000e+00> : vector<8x128xf32>
    %10 = tpu.matmul %1, %0, %cst_8 {dimension_numbers = #tpu.dot_dimension_numbers<[1], [0], [0], [1], [0, 0, 1, 1], [], []>, precision = #tpu.contract_precision<fp32>} : vector<8x256xf32>, vector<256x128xf32>, vector<8x128xf32> -> vector<8x128xf32>
    %c0_9 = arith.constant 0 : index
    %c128 = arith.constant 128 : index
    %11 = vector.load %arg5[%c0_9, %c128] : memref<8x256xf32, #tpu.memory_space<vmem>>, vector<8x128xf32>
    tpu.vector_store %arg5[%c0_9, %c128], %10 {strides = array<i32>} : memref<8x256xf32, #tpu.memory_space<vmem>>, vector<8x128xf32>,
    return
  }
  func.func @transform_0(%arg0: i32, %arg1: i32) -> (i32, i32) {
    %c0_i32 = arith.constant 0 : i32
    return %arg0, %arg1 : i32, i32
  }
  func.func @transform_1(%arg0: i32, %arg1: i32) -> (i32, i32) {
    %c2_i32 = arith.constant 2 : i32
    %0 = arith.muli %arg1, %c2_i32 : i32
    %c1_i32 = arith.constant 1 : i32
    %1 = arith.subi %0, %c1_i32 : i32
    %c0_i32 = arith.constant 0 : i32
    %2 = arith.maxsi %1, %c0_i32 : i32
    %c0_i32_0 = arith.constant 0 : i32
    return %arg0, %2 : i32, i32
  }
  func.func @transform_2(%arg0: i32, %arg1: i32) -> (i32, i32) {
    %c0_i32 = arith.constant 0 : i32
    %c0_i32_0 = arith.constant 0 : i32
    %c0_i32_1 = arith.constant 0 : i32
    return %c0_i32, %c0_i32_0 : i32, i32
  }
  func.func @transform_3(%arg0: i32, %arg1: i32) -> (i32, i32) {
    %c0_i32 = arith.constant 0 : i32
    return %arg0, %arg1 : i32, i32
  }
}

</mosaic_0001>

<bundles_post_ra>
// kernel: tpu_custom_call.1
= control target key start
LH: loop header
LB: loop body
LE: loop exit
PB: predicated region body
PF: predicated region fallthrough
CT: control target
= control target key end

     0   :  { %s3110_s0 = inlined_call_operand.hbm [shape: f32[16,256], index: 0, kind: input, shape index: {}]   ;;  %s3111_s1 = inlined_call_operand.hbm [shape: f32[16,256], index: 1, kind: input, shape index: {}]   ;;  %s3112_s2 = inlined_call_operand.hbm [shape: f32[256,128], index: 2, kind: input, shape index: {}]   ;;  %s3113_s3 = inlined_call_operand.hbm [shape: f32[16,256], index: 3, kind: output, shape index: {}]  }
   0x1   :  { %3214 = sst [smem:[#allocation102_spill]] %s3112_s2 }
   0x2   :  { %8 = vsyncpa [#allocation3], 0 }
   0x3   :  { %10 = vsyncpa [#allocation3 + $0x1], 0 }
   0x4   :  { %11 = vsyncpa [#allocation6], 0 }
   0x5   :  { %13 = vsyncpa [#allocation6 + $0x1], 0 }
   0x6   :  { %14 = vsyncpa [#allocation4], 0 }
   0x7   :  { %16 = vsyncpa [#allocation4 + $0x1], 0  ;;  %s2138_s12 = smov 0   ;;  %s2140_s13 = smov 0  }
   0x8   :  { %s2142_s14 = smov 0   ;;  %s2144_s15 = smov 0  }
   0x9   :  { %s2146_s16 = smov 0   ;;  %s2148_s17 = smov 0  }
   0xa LB: > { %3215 = sst [smem:[#allocation13_spill]] %s2108_s16  ;;  %s2169_s18 = sadd.s32 4294967295, %s2112_s17   ;;  %s2112_s17 = sphi %s2148_s17, %s22_s17   ;;  %s2108_s16 = sphi %s2146_s16, %s3400_s16   ;;  %s2104_s15 = sphi %s2144_s15, %s3399_s15   ;;  %s2100_s14 = sphi %s2142_s14, %s3403_s14   ;;  %s2096_s13 = sphi %s2140_s13, %s3402_s13   ;;  %s2092_s12 = sphi %s2138_s12, %s3401_s12  }
   0xb   : > { %p1829_p0 = scmp.ge.s32.totalorder %s2112_s17, 1  ;;  %p57_p1 = scmp.eq.s32.totalorder %s2169_s18, 0 }
   0xc   : > { %p152_p2 = scmp.lt.s32.totalorder %s2112_s17, 3  ;;  %s3216_s2 = sld [smem:[#allocation102_spill]] }
   0xd   : > { %s2114_s23 = smov [#allocation7]   ;;  %p1831_p6 = scmp.ge.s32.totalorder %s2112_s17, 2 }
   0xe   : > { %p2177_p3 = pnand %p1829_p0, %p152_p2  ;;  %s165_s24 = sshll.u32 %s2114_s23, 4  ;;  %s166_s24 = int_to_ptr.vmem [resolvable:$true] %s165_s24 }
   0xf   : > { %s2115_s25 = smov 128   ;;  %s2116_s26 = smov 8  }
  0x10   : > { %p1861_p4 = pneg %p2177_p3  ;;  %s1828_s27 = sadd.s32 4294967294, %s2112_s17  }
  0x11   : > { %s34_s28 = sadd.s32 1, %s2108_s16  ;;  %s43_s29 = sadd.s32 1, %s2100_s14 }
  0x12   : > { %s163_s21 = sshll.u32 %s3216_s2, 4  ;;  %p1862_p5 = pnand %p1861_p4, %p57_p1  ;;  %s164_s21 = int_to_ptr.hbm [resolvable:$true] %s163_s21 }
  0x13   : > { %p36_p7 = scmp.ge.s32.totalorder %s34_s28, 2  ;;  %p50_p8 = scmp.ne.s32.totalorder %s2100_s14, %s2096_s13 }
  0x14   : > { %1864 = dma.hbm_to_vmem [thread:$0]  (!%p1862_p5), %s164_s21, 4096, %s166_s24, [#allocation6], %s2115_s25, %s2115_s25, %s2116_s26  }
  0x15   : > { %p51_p9 = scmp.eq.s32.totalorder %s2112_s17, 0  ;;  %p56_p10 = scmp.ne.s32.totalorder %s2096_s13, %s2092_s12 }
  0x16   : > { %s3405_s28 = smov (%p36_p7, %s34_s28), 0  ;;  %p139_p13 = scmp.eq.s32.totalorder %s2169_s18, 1 }
  0x17   : > { %3218 = sst [smem:[#allocation14_spill]] %s3405_s28  ;;  %p2196_p11 = por %p51_p9, %p50_p8 }
  0x18   : > { %p2202_p12 = por %p57_p1, %p56_p10  ;;  %s38_s5 = ssub.s32 %s2108_s16, %s3405_s28 }
  0x19   : > { %p41_p0 = scmp.eq.s32.totalorder %s38_s5, 0  ;;  %p145_p2 = scmp.eq.s32.totalorder %s1828_s27, 1 }
  0x1a   : > { %p2209_p4 = por %p139_p13, %p50_p8  ;;  %p1877_p5 = scmp.lt.s32.totalorder %s2112_s17, 2 }
  0x1b   : > { %s2215_s7 = scalar_select %p41_p0, %s2100_s14, %s43_s29  }
  0x1c   : > { %p2217_p7 = por %p145_p2, %p56_p10  ;;  %s179_s9 = sand.u32 1, %s2100_s14  }
  0x1d   : > { %3222 = sst [smem:[#allocation15_spill]] %s2215_s7  ;;  %s1832_s10 = sshll.u32 %s179_s9, 4 }
  0x1e   : > { %s1848_s11 = sshll.u32 %s2108_s16, 4  ;;  %s183_s23 = scalar_lea.vmem [#allocation2], %s1832_s10 }
  0x1f   : > { %s190_s21 = scalar_lea.hbm %s3110_s0, %s1848_s11  ;;  %s194_s24 = sshll.u32 %s183_s23, 4  ;;  %s195_s24 = int_to_ptr.vmem [resolvable:$true] %s194_s24 }
  0x20   : > { %s192_s25 = sshll.u32 %s190_s21, 4  ;;  %p1866_p8 = pnand %p1877_p5, %p2196_p11  ;;  %s193_s25 = int_to_ptr.hbm [resolvable:$true] %s192_s25 }
  0x21   : > { %s215_s29 = scalar_lea.hbm %s3111_s1, %s1848_s11  ;;  %s201_s5 = sand.u32 1, %s2112_s17  }
  0x22   : > { %s180_s2 = scalar_lea.sflag [#allocation3], %s179_s9  ;;  %s1835_s28 = sshll.u32 %s179_s9, 3 }
  0x23   : > { %1868 = dma.hbm_to_vmem [thread:$0]  (!%p1866_p8), %s193_s25, 256, %s195_s24, %s180_s2  }
  0x24   : > { %s217_s16 = sshll.u32 %s215_s29, 4  ;;  %s205_s7 = scalar_lea.vmem [#allocation5], %s1835_s28  ;;  %s218_s16 = int_to_ptr.hbm [resolvable:$true] %s217_s16 }
  0x25   : > { %s219_s19 = sshll.u32 %s205_s7, 4  ;;  %s202_s10 = scalar_lea.sflag [#allocation6], %s201_s5  ;;  %s220_s19 = int_to_ptr.vmem [resolvable:$true] %s219_s19 }
  0x26   : > { %1871 = dma.hbm_to_vmem [thread:$0]  (!%p1866_p8), %s218_s16, 128, %s220_s19, %s202_s10  }
  0x27   : > { %228 = sbr.rel (%p2177_p3) target bundleno = 412 (0x19c), region = 32 }
  0x2c   : > { %s2235_s30 = sand.u32 1, %s2096_s13  }
  0x2d   : > { %s1839_s11 = sshll.u32 %s2235_s30, 4  ;;  %s231_s2 = scalar_lea.sflag [#allocation3], %s2235_s30 }
  0x2e   : > { %s2241_s9 = scalar_lea.vmem [#allocation2], %s1839_s11 }
  0x2f   : > { %2075 = dma.done.wait (%p2202_p12), %s231_s2, 256  }
  0x30   : > { %2077 = vsyncadd (%p2202_p12), %s231_s2, 4294967040  ;;  %s240_s16 = sand.u32 1, %s2169_s18  }
  0x31   : > { %s241_s22 = scalar_lea.sflag [#allocation6], %s240_s16 }
  0x32   : > { %2079 = dma.done.wait (%p2202_p12), %s241_s22, 128  }
  0x33   : > { %2081 = vsyncadd (%p2202_p12), %s241_s22, 4294967168 }
  0x34   : > { %2083 = dma.done.wait (%p57_p1), [#allocation6], 4096  }
  0x35   : > { %2085 = vsyncadd (%p57_p1), [#allocation6], 4294963200  ;;  %v299_v0 = vld [vmem:[#allocation7 + $0x78] sm:$0xff]  ;;  %v298_v1 = vld [vmem:[#allocation7 + $0x70] sm:$0xff]  ;;  %s3067_s18 = scalar_lea.vmem [#allocation8], %s1839_s11  ;;  %s1850_s28 = sshll.u32 %s2104_s15, 4 }
  0x36   : > { %v297_v2 = vld [vmem:[#allocation7 + $0x68] sm:$0xff]  ;;  %v2256_v3 = vand.u32 4294901760, %v299_v0  ;;  %v2258_v4 = vand.u32 4294901760, %v298_v1  ;;  %v296_v6 = vld [vmem:[#allocation7 + $0x60] sm:$0xff]  ;;  %v295_v7 = vld [vmem:[#allocation7 + $0x58] sm:$0xff]  ;;  %s1704_s20 = scalar_lea.hbm %s3113_s3, %s1850_s28  ;;  %s1706_s21 = sshll.u32 %s3067_s18, 4  ;;  %s1707_s21 = int_to_ptr.vmem [resolvable:$true] %s1706_s21 }
  0x37   : > { %v2260_v5 = vand.u32 4294901760, %v297_v2  ;;  %v294_v8 = vld [vmem:[#allocation7 + $0x50] sm:$0xff]  ;;  %v2262_v9 = vand.u32 4294901760, %v296_v6  ;;  %v2264_v10 = vand.u32 4294901760, %v295_v7  ;;  %v293_v12 = vld [vmem:[#allocation7 + $0x48] sm:$0xff]  ;;  %v292_v13 = vld [vmem:[#allocation7 + $0x40] sm:$0xff] }
  0x38   : > { %3224 = vst [vmem:[#allocation16_spill] sm:$0xff] %v2256_v3  ;;  %v2266_v11 = vand.u32 4294901760, %v294_v8  ;;  %325 = vmatpush.msra.mxu0 %v2256_v3  ;;  %v2270_v14 = vsub.f32 %v299_v0, %v2256_v3  ;;  %v2273_v15 = vsub.f32 %v298_v1, %v2258_v4  ;;  %521 = vmatpush.msra.mxu3 %v2256_v3  ;;  %v2279_v17 = vand.u32 4294901760, %v293_v12  ;;  %v291_v18 = vld [vmem:[#allocation7 + $0x38] sm:$0xff]  ;;  %v290_v26 = vld [vmem:[#allocation7 + $0x30] sm:$0xff]  ;;  %v289_v34 = vld [vmem:[#allocation7 + $0x28] sm:$0xff] }
  0x39   : > { %3225 = vst [vmem:[#allocation17_spill] sm:$0xff] %v2258_v4  ;;  %v2277_v16 = vsub.f32 %v297_v2, %v2260_v5  ;;  %v2282_v19 = vsub.f32 %v296_v6, %v2262_v9  ;;  %v2285_v20 = vsub.f32 %v295_v7, %v2264_v10  ;;  %v2287_v21 = vand.u32 4294901760, %v292_v13  ;;  %v288_v42 = vld [vmem:[#allocation7 + $0x20] sm:$0xff]  ;;  %v287_v48 = vld [vmem:[#allocation7 + $0x18] sm:$0xff]  ;;  %v286_v54 = vld [vmem:[#allocation7 + $0x10] sm:$0xff]  ;;  %s1708_s23 = sshll.u32 %s1704_s20, 4  ;;  %s1709_s23 = int_to_ptr.hbm [resolvable:$true] %s1708_s23 }
  0x3a   : > { %3226 = vst [vmem:[#allocation18_spill] sm:$0xff] %v2260_v5  ;;  %327 = vmatpush.msra.mxu0 %v2258_v4  ;;  %468 = vmatpush.msra.mxu2 %v2270_v14  ;;  %v2292_v22 = vand.u32 4294901760, %v2270_v14  ;;  %v2295_v23 = vand.u32 4294901760, %v2273_v15  ;;  %v2301_v25 = vsub.f32 %v294_v8, %v2266_v11  ;;  %v2307_v28 = vand.u32 4294901760, %v291_v18  ;;  %v315_v59 = vld [vmem:[#allocation7 + $0xf8] sm:$0xff]  ;;  %v285_v61 = vld [vmem:[#allocation7 + $0x8] sm:$0xff] }
  0x3b   : > { %3227 = vst [vmem:[#allocation19_spill] sm:$0xff] %v2262_v9  ;;  %v2298_v24 = vand.u32 4294901760, %v2277_v16  ;;  %523 = vmatpush.msra.mxu3 %v2258_v4  ;;  %v2305_v27 = vand.u32 4294901760, %v2282_v19  ;;  %v2310_v29 = vsub.f32 %v293_v12, %v2279_v17  ;;  %v2321_v33 = vand.u32 4294901760, %v2285_v20  ;;  %v314_v2 = vld [vmem:[#allocation7 + $0xf0] sm:$0xff]  ;;  %v284_v7 = vld [vmem:[#allocation7] sm:$0xff] }
  0x3c   : > { %3228 = vst [vmem:[#allocation20_spill] sm:$0xff] %v2264_v10  ;;  %329 = vmatpush.msra.mxu0 %v2260_v5  ;;  %471 = vmatpush.msra.mxu2 %v2273_v15  ;;  %v368_v30 = vsub.f32 %v2270_v14, %v2292_v22  ;;  %v374_v31 = vsub.f32 %v2273_v15, %v2295_v23  ;;  %v2324_v35 = vand.u32 4294901760, %v290_v26  ;;  %v2338_v40 = vand.u32 4294901760, %v2301_v25  ;;  %s1691_s24 = scalar_lea.sflag [#allocation4], %s2235_s30  ;;  %s2036_s25 = sshra.s32 %s1709_s23, 4  ;;  %s2037_s25 = int_to_ptr.hbm [resolvable:$true] %s2036_s25 }
  0x3d   : > { %3229 = vst [vmem:[#allocation21_spill] sm:$0xff] %v2270_v14  ;;  %v380_v32 = vsub.f32 %v2277_v16, %v2298_v24  ;;  %525 = vmatpush.msra.mxu3 %v2260_v5  ;;  %v2327_v36 = vsub.f32 %v292_v13, %v2287_v21  ;;  %v386_v39 = vsub.f32 %v2282_v19, %v2305_v27  ;;  %v2341_v41 = vand.u32 4294901760, %v289_v34  ;;  %s2038_s15 = scalar_lea.hbm %s2037_s25, 16  ;;  %s2042_s29 = scalar_lea.hbm %s3113_s3, 32 }
  0x3e   : > { %3230 = vst [vmem:[#allocation22_spill] sm:$0xff] %v2273_v15  ;;  %331 = vmatpush.msra.mxu0 %v2262_v9  ;;  %v2330_v37 = vand.u32 4294901760, %v368_v30  ;;  %474 = vmatpush.msra.mxu2 %v2277_v16  ;;  %v2333_v38 = vand.u32 4294901760, %v374_v31  ;;  %v392_v44 = vsub.f32 %v2285_v20, %v2321_v33  ;;  %v2350_v45 = vand.u32 4294901760, %v2310_v29  ;;  %p2039_p1 = scmp.ne.s32.totalorder %s2037_s25, %s2038_s15  ;;  %p2043_p10 = scmp.lt.s32.totalorder %s2037_s25, %s3113_s3 }
  0x3f   : > { %3231 = vst [vmem:[#allocation23_spill] sm:$0xff] %v2277_v16  ;;  %527 = vmatpush.msra.mxu3 %v2262_v9  ;;  %v2345_v43 = vand.u32 4294901760, %v380_v32  ;;  %v2353_v46 = vsub.f32 %v291_v18, %v2307_v28  ;;  %v2358_v47 = vand.u32 4294901760, %v2327_v36  ;;  %v2362_v49 = vand.u32 4294901760, %v386_v39  ;;  %v313_v32 = vld [vmem:[#allocation7 + $0xe8] sm:$0xff]  ;;  %p2044_p11 = scmp.lt.s32.totalorder %s2042_s29, %s2038_s15 }
  0x40   : > { %3232 = vst [vmem:[#allocation24_spill] sm:$0xff] %v2282_v19  ;;  %333 = vmatpush.msra.mxu0 %v2264_v10  ;;  %370 = vmatpush.msra.mxu1 %v2330_v37  ;;  %v398_v50 = vsub.f32 %v2301_v25, %v2338_v40  ;;  %v2366_v51 = vand.u32 4294901760, %v288_v42  ;;  %v2369_v52 = vsub.f32 %v290_v26, %v2324_v35  ;;  %v2378_v55 = vand.u32 4294901760, %v392_v44  ;;  %p2040_p3 = pnand %p2039_p1, %p2209_p4 }
  0x41   : > { %3233 = vst [vmem:[#allocation25_spill] sm:$0xff] %v2285_v20  ;;  %477 = vmatpush.msra.mxu2 %v2282_v19  ;;  %529 = vmatpush.msra.mxu3 %v2264_v10  ;;  %v2374_v53 = vsub.f32 %v289_v34, %v2341_v41  ;;  %v404_v56 = vsub.f32 %v2310_v29, %v2350_v45  ;;  %v2382_v57 = vand.u32 4294901760, %v287_v48  ;;  %v2385_v58 = vand.u32 4294901760, %v2353_v46  ;;  %p2045_p12 = por %p2044_p11, %p2043_p10 }
  0x42   : > { %3234 = vst [vmem:[#allocation26_spill] sm:$0xff] %v2292_v22  ;;  %335 = vmatpush.msra.mxu0 %v2266_v11  ;;  %376 = vmatpush.msra.mxu1 %v2333_v38  ;;  %v410_v60 = vsub.f32 %v2327_v36, %v2358_v47  ;;  %v2393_v62 = vand.u32 4294901760, %v398_v50  ;;  %v2395_v63 = vand.u32 4294901760, %v286_v54  ;;  %v2398_v0 = vand.u32 4294901760, %v2369_v52  ;;  %p2041_p9 = pneg %p2040_p3 }
  0x43   : > { %3235 = vst [vmem:[#allocation27_spill] sm:$0xff] %v2295_v23  ;;  %480 = vmatpush.msra.mxu2 %v2285_v20  ;;  %531 = vmatpush.msra.mxu3 %v2266_v11  ;;  %v2401_v1 = vsub.f32 %v288_v42, %v2366_v51  ;;  %v2406_v6 = vand.u32 4294901760, %v2374_v53  ;;  %v2408_v8 = vand.u32 4294901760, %v315_v59  ;;  %v2412_v12 = vand.u32 4294901760, %v404_v56 }
  0x44   : > { %3236 = vst [vmem:[#allocation28_spill] sm:$0xff] %v2298_v24  ;;  %337 = vmatpush.msra.mxu0 %v2279_v17  ;;  %382 = vmatpush.msra.mxu1 %v2345_v43  ;;  %v416_v13 = vsub.f32 %v2353_v46, %v2385_v58  ;;  %v2416_v18 = vand.u32 4294901760, %v285_v61  ;;  %v2419_v26 = vsub.f32 %v287_v48, %v2382_v57  ;;  %v2422_v30 = vand.u32 4294901760, %v410_v60  ;;  %v312_v48 = vld [vmem:[#allocation7 + $0xe0] sm:$0xff]  ;;  %p2046_p13 = pnand %p2045_p12, %p2041_p9 }
  0x45   : > { %3237 = vst [vmem:[#allocation29_spill] sm:$0xff] %v2301_v25  ;;  %483 = vmatpush.msra.mxu2 %v2301_v25  ;;  %533 = vmatpush.msra.mxu3 %v2279_v17  ;;  %v2425_v31 = vand.u32 4294901760, %v314_v2  ;;  %v422_v34 = vsub.f32 %v2369_v52, %v2398_v0  ;;  %v2431_v39 = vand.u32 4294901760, %v284_v7  ;;  %v2434_v42 = vand.u32 4294901760, %v2401_v1 }
  0x46   : > { %3238 = vst [vmem:[#allocation30_spill] sm:$0xff] %v2305_v27  ;;  %339 = vmatpush.msra.mxu0 %v2287_v21  ;;  %388 = vmatpush.msra.mxu1 %v2362_v49  ;;  %v2437_v44 = vsub.f32 %v286_v54, %v2395_v63  ;;  %v428_v50 = vsub.f32 %v2374_v53, %v2406_v6  ;;  %v2448_v60 = vand.u32 4294901760, %v416_v13  ;;  %v2451_v54 = vand.u32 4294901760, %v2419_v26 }
  0x47   : > { %3239 = vst [vmem:[#allocation31_spill] sm:$0xff] %v2310_v29  ;;  %486 = vmatpush.msra.mxu2 %v2310_v29  ;;  %535 = vmatpush.msra.mxu3 %v2287_v21  ;;  %v2444_v56 = vsub.f32 %v315_v59, %v2408_v8  ;;  %v2461_v59 = vsub.f32 %v314_v2, %v2425_v31  ;;  %v2467_v13 = vand.u32 4294901760, %v422_v34  ;;  %v310_v34 = vld [vmem:[#allocation7 + $0xd0] sm:$0xff] }
  0x48   : > { %3240 = vst [vmem:[#allocation32_spill] sm:$0xff] %v2321_v33  ;;  %341 = vmatpush.msra.mxu0 %v2307_v28  ;;  %394 = vmatpush.msra.mxu1 %v2378_v55  ;;  %v2478_v2 = vand.u32 4294901760, %v428_v50 }
  0x49   : > { %3241 = vst [vmem:[#allocation33_spill] sm:$0xff] %v2327_v36  ;;  %489 = vmatpush.msra.mxu2 %v2327_v36  ;;  %537 = vmatpush.msra.mxu3 %v2307_v28  ;;  %v2463_v36 = vand.u32 4294901760, %v312_v48  ;;  %v2482_v29 = vand.u32 4294901760, %v2444_v56  ;;  %v2499_v25 = vand.u32 4294901760, %v2461_v59 }
  0x4a   : > { %3242 = vst [vmem:[#allocation34_spill] sm:$0xff] %v2330_v37  ;;  %343 = vmatpush.msra.mxu0 %v2324_v35  ;;  %400 = vmatpush.msra.mxu1 %v2393_v62 }
  0x4b   : > { %3243 = vst [vmem:[#allocation35_spill] sm:$0xff] %v2333_v38  ;;  %492 = vmatpush.msra.mxu2 %v2353_v46  ;;  %539 = vmatpush.msra.mxu3 %v2324_v35  ;;  %v715_v16 = vsub.f32 %v2461_v59, %v2499_v25 }
  0x4c   : > { %3244 = vst [vmem:[#allocation36_spill] sm:$0xff] %v2338_v40  ;;  %345 = vmatpush.msra.mxu0 %v2341_v41  ;;  %406 = vmatpush.msra.mxu1 %v2412_v12 }
  0x4d   : > { %3245 = vst [vmem:[#allocation37_spill] sm:$0xff] %v2345_v43  ;;  %495 = vmatpush.msra.mxu2 %v2369_v52  ;;  %541 = vmatpush.msra.mxu3 %v2341_v41 }
  0x4e   : > { %3246 = vst [vmem:[#allocation38_spill] sm:$0xff] %v2350_v45  ;;  %347 = vmatpush.msra.mxu0 %v2366_v51  ;;  %412 = vmatpush.msra.mxu1 %v2422_v30 }
  0x4f   : > { %3247 = vst [vmem:[#allocation39_spill] sm:$0xff] %v2353_v46  ;;  %v2456_v46 = vand.u32 4294901760, %v313_v32  ;;  %498 = vmatpush.msra.mxu2 %v2374_v53  ;;  %543 = vmatpush.msra.mxu3 %v2366_v51 }
  0x50   : > { %3248 = vst [vmem:[#allocation40_spill] sm:$0xff] %v2358_v47  ;;  %349 = vmatpush.msra.mxu0 %v2382_v57  ;;  %418 = vmatpush.msra.mxu1 %v2448_v60 }
  0x51   : > { %3249 = vst [vmem:[#allocation41_spill] sm:$0xff] %v2362_v49  ;;  %v309_v49 = vld [vmem:[#allocation7 + $0xc8] sm:$0xff]  ;;  %501 = vmatpush.msra.mxu2 %v2401_v1  ;;  %545 = vmatpush.msra.mxu3 %v2382_v57 }
  0x52   : > { %3250 = vst [vmem:[#allocation42_spill] sm:$0xff] %v2369_v52  ;;  %v2475_v52 = vsub.f32 %v284_v7, %v2431_v39  ;;  %351 = vmatpush.msra.mxu0 %v2395_v63  ;;  %424 = vmatpush.msra.mxu1 %v2467_v13  ;;  %v2519_v38 = vand.u32 4294901760, %v309_v49 }
  0x53   : > { %3251 = vst [vmem:[#allocation43_spill] sm:$0xff] %v2374_v53  ;;  %v2492_v53 = vsub.f32 %v313_v32, %v2456_v46  ;;  %504 = vmatpush.msra.mxu2 %v2419_v26  ;;  %547 = vmatpush.msra.mxu3 %v2395_v63 }
  0x54   : > { %3252 = vst [vmem:[#allocation44_spill] sm:$0xff] %v2378_v55  ;;  %v2472_v55 = vand.u32 4294901760, %v2437_v44  ;;  %v2511_v20 = vand.u32 4294901760, %v2475_v52  ;;  %353 = vmatpush.msra.mxu0 %v2416_v18  ;;  %430 = vmatpush.msra.mxu1 %v2478_v2 }
  0x55   : > { %3253 = vst [vmem:[#allocation45_spill] sm:$0xff] %v2385_v58  ;;  %v2528_v37 = vand.u32 4294901760, %v2492_v53  ;;  %507 = vmatpush.msra.mxu2 %v2437_v44  ;;  %549 = vmatpush.msra.mxu3 %v2416_v18 }
  0x56   : > { %3254 = vst [vmem:[#allocation46_spill] sm:$0xff] %v2393_v62  ;;  %v2454_v62 = vsub.f32 %v285_v61, %v2416_v18  ;;  %v434_v61 = vsub.f32 %v2401_v1, %v2434_v42  ;;  %v446_v32 = vsub.f32 %v2437_v44, %v2472_v55  ;;  %355 = vmatpush.msra.mxu0 %v2431_v39 }
  0x57   : > { %3255 = vst [vmem:[#allocation47_spill] sm:$0xff] %v2398_v0  ;;  %551 = vmatpush.msra.mxu3 %v2431_v39 }
  0x58   : > { %3256 = vst [vmem:[#allocation48_spill] sm:$0xff] %v2401_v1  ;;  %v2489_v7 = vand.u32 4294901760, %v2454_v62  ;;  %v2506_v43 = vand.u32 4294901760, %v434_v61  ;;  %v2513_v1 = vand.u32 4294901760, %v310_v34  ;;  %v2542_v15 = vand.u32 4294901760, %v446_v32  ;;  %562 = vmatpush.msrb.mxu0 %v2292_v22  ;;  %510 = vmatpush.msra.mxu2 %v2454_v62 }
  0x59   : > { %3257 = vst [vmem:[#allocation49_spill] sm:$0xff] %v2406_v6 }
  0x5a   : > { %3258 = vst [vmem:[#allocation50_spill] sm:$0xff] %v2412_v12  ;;  %v311_v12 = vld [vmem:[#allocation7 + $0xd8] sm:$0xff]  ;;  %v452_v19 = vsub.f32 %v2454_v62, %v2489_v7  ;;  %436 = vmatpush.msra.mxu1 %v2506_v43  ;;  %566 = vmatpush.msrb.mxu0 %v2295_v23 }
  0x5b   : > { %3259 = vst [vmem:[#allocation51_spill] sm:$0xff] %v2416_v18  ;;  %v2494_v50 = vand.u32 4294901760, %v311_v12  ;;  %v2556_v18 = vsub.f32 %v309_v49, %v2519_v38  ;;  %513 = vmatpush.msra.mxu2 %v2475_v52  ;;  %v2571_v49 = vand.u32 4294901760, %v715_v16 }
  0x5c   : > { %3260 = vst [vmem:[#allocation52_spill] sm:$0xff] %v2419_v26  ;;  %v2559_v32 = vand.u32 4294901760, %v452_v19  ;;  %570 = vmatpush.msrb.mxu0 %v2298_v24  ;;  %v303_v24 = vld [vmem:[#allocation7 + $0x98] sm:$0xff] }
  0x5d   : > { %3261 = vst [vmem:[#allocation53_spill] sm:$0xff] %v2422_v30  ;;  %v440_v30 = vsub.f32 %v2419_v26, %v2451_v54  ;;  %v2531_v26 = vsub.f32 %v311_v12, %v2494_v50  ;;  %v458_v12 = vsub.f32 %v2475_v52, %v2511_v20  ;;  %666 = vmatpush.msrb.mxu2 %v2408_v8  ;;  %v2590_v16 = vand.u32 4294901760, %v2556_v18 }
  0x5e   : > { %3262 = vst [vmem:[#allocation54_spill] sm:$0xff] %v2437_v44  ;;  %v2547_v44 = vsub.f32 %v310_v34, %v2513_v1  ;;  %v721_v34 = vsub.f32 %v2492_v53, %v2528_v37  ;;  %574 = vmatpush.msrb.mxu0 %v2305_v27  ;;  %v2633_v27 = vand.u32 4294901760, %v303_v24 }
  0x5f   : > { %3263 = vst [vmem:[#allocation55_spill] sm:$0xff] %v2444_v56  ;;  %v2523_v61 = vand.u32 4294901760, %v440_v30  ;;  %v307_v30 = vld [vmem:[#allocation7 + $0xb8] sm:$0xff]  ;;  %668 = vmatpush.msrb.mxu2 %v2425_v31 }
  0x60   : > { %3264 = vst [vmem:[#allocation56_spill] sm:$0xff] %v2448_v60  ;;  %v2502_v60 = vsub.f32 %v312_v48, %v2463_v36  ;;  %v709_v48 = vsub.f32 %v2444_v56, %v2482_v29  ;;  %v2567_v22 = vand.u32 4294901760, %v307_v30  ;;  %578 = vmatpush.msrb.mxu0 %v2321_v33  ;;  %v302_v33 = vld [vmem:[#allocation7 + $0x90] sm:$0xff] }
  0x61   : > { %3265 = vst [vmem:[#allocation57_spill] sm:$0xff] %v2451_v54  ;;  %442 = vmatpush.msra.mxu1 %v2523_v61  ;;  %670 = vmatpush.msrb.mxu2 %v2456_v46 }
  0x62   : > { %3266 = vst [vmem:[#allocation58_spill] sm:$0xff] %v2454_v62  ;;  %v2580_v62 = vand.u32 4294901760, %v2547_v44  ;;  %582 = vmatpush.msrb.mxu0 %v2338_v40 }
  0x63   : > { %3267 = vst [vmem:[#allocation59_spill] sm:$0xff] %v2461_v59  ;;  %448 = vmatpush.msra.mxu1 %v2542_v15  ;;  %672 = vmatpush.msrb.mxu2 %v2463_v36 }
  0x64   : > { %3268 = vst [vmem:[#allocation60_spill] sm:$0xff] %v2467_v13  ;;  %v308_v13 = vld [vmem:[#allocation7 + $0xc0] sm:$0xff]  ;;  %586 = vmatpush.msrb.mxu0 %v2350_v45 }
  0x65   : > { %3269 = vst [vmem:[#allocation61_spill] sm:$0xff] %v2472_v55  ;;  %v2549_v14 = vand.u32 4294901760, %v308_v13  ;;  %454 = vmatpush.msra.mxu1 %v2559_v32  ;;  %674 = vmatpush.msrb.mxu2 %v2494_v50 }
  0x66   : > { %3270 = vst [vmem:[#allocation62_spill] sm:$0xff] %v2475_v52  ;;  %v2599_v52 = vsub.f32 %v307_v30, %v2567_v22  ;;  %590 = vmatpush.msrb.mxu0 %v2358_v47 }
  0x67   : > { %3271 = vst [vmem:[#allocation63_spill] sm:$0xff] %v2478_v2  ;;  %v2538_v2 = vand.u32 4294901760, %v2502_v60  ;;  %676 = vmatpush.msrb.mxu2 %v2513_v1 }
  0x68   : > { %3272 = vst [vmem:[#allocation64_spill] sm:$0xff] %v2482_v29  ;;  %v2565_v29 = vand.u32 4294901760, %v2531_v26  ;;  %594 = vmatpush.msrb.mxu0 %v2385_v58 }
  0x69   : > { %3273 = vst [vmem:[#allocation65_spill] sm:$0xff] %v2489_v7  ;;  %v727_v19 = vsub.f32 %v2502_v60, %v2538_v2  ;;  %678 = vmatpush.msrb.mxu2 %v2519_v38 }
  0x6a   : > { %3274 = vst [vmem:[#allocation66_spill] sm:$0xff] %v2499_v25  ;;  %v2553_v25 = vand.u32 4294901760, %v709_v48  ;;  %v305_v48 = vld [vmem:[#allocation7 + $0xa8] sm:$0xff]  ;;  %598 = vmatpush.msrb.mxu0 %v2398_v0 }
  0x6b   : > { %3275 = vst [vmem:[#allocation67_spill] sm:$0xff] %v2506_v43  ;;  %v306_v43 = vld [vmem:[#allocation7 + $0xb0] sm:$0xff]  ;;  %680 = vmatpush.msrb.mxu2 %v2549_v14 }
  0x6c   : > { %3276 = vst [vmem:[#allocation68_spill] sm:$0xff] %v2523_v61  ;;  %v2577_v61 = vand.u32 4294901760, %v458_v12  ;;  %v2585_v23 = vand.u32 4294901760, %v306_v43  ;;  %711 = vmatpush.msrb.mxu3 %v2553_v25  ;;  %v2594_v12 = vand.u32 4294901760, %v721_v34  ;;  %v739_v34 = vsub.f32 %v2547_v44, %v2580_v62  ;;  %602 = vmatpush.msrb.mxu0 %v2406_v6 }
  0x6d   : > { %3277 = vst [vmem:[#allocation69_spill] sm:$0xff] %v2528_v37  ;;  %v2583_v37 = vsub.f32 %v308_v13, %v2549_v14  ;;  %v733_v13 = vsub.f32 %v2531_v26, %v2565_v29  ;;  %682 = vmatpush.msrb.mxu2 %v2567_v22 }
  0x6e   : > { %3278 = vst [vmem:[#allocation70_spill] sm:$0xff] %v2538_v2  ;;  %v2601_v2 = vand.u32 4294901760, %v305_v48  ;;  %717 = vmatpush.msrb.mxu3 %v2571_v49  ;;  %460 = vmatpush.msra.mxu1 %v2577_v61  ;;  %v2615_v30 = vsub.f32 %v306_v43, %v2585_v23 }
  0x6f   : > { %3279 = vst [vmem:[#allocation71_spill] sm:$0xff] %v2542_v15  ;;  %v304_v15 = vld [vmem:[#allocation7 + $0xa0] sm:$0xff]  ;;  %684 = vmatpush.msrb.mxu2 %v2585_v23  ;;  %606 = vmatpush.msrb.mxu0 %v2434_v42 }
  0x70   : > { %3280 = vst [vmem:[#allocation72_spill] sm:$0xff] %v2553_v25  ;;  %v2605_v25 = vand.u32 4294901760, %v727_v19  ;;  %629 = vmatpush.msrb.mxu1 %v2256_v3  ;;  %v745_v19 = vsub.f32 %v2556_v18, %v2590_v16  ;;  %723 = vmatpush.msrb.mxu3 %v2594_v12  ;;  %v2631_v43 = vsub.f32 %v305_v48, %v2601_v2  ;;  %v2644_v3 = vand.u32 4294901760, %v2615_v30 }
  0x71   : > { %3281 = vst [vmem:[#allocation73_spill] sm:$0xff] %v2559_v32  ;;  %v2612_v32 = vand.u32 4294901760, %v2583_v37  ;;  %686 = vmatpush.msrb.mxu2 %v2601_v2  ;;  %610 = vmatpush.msrb.mxu0 %v2451_v54 }
  0x72   : > { %3282 = vst [vmem:[#allocation74_spill] sm:$0xff] %v2565_v29  ;;  %v2617_v29 = vand.u32 4294901760, %v304_v15  ;;  %631 = vmatpush.msrb.mxu1 %v2258_v4  ;;  %729 = vmatpush.msrb.mxu3 %v2605_v25  ;;  %v2651_v40 = vand.u32 4294901760, %v745_v19  ;;  %v301_v4 = vld [vmem:[#allocation7 + $0x88] sm:$0xff] }
  0x73   : > { %3283 = vst [vmem:[#allocation75_spill] sm:$0xff] %v2571_v49  ;;  %v2625_v49 = vand.u32 4294901760, %v733_v13  ;;  %v751_v13 = vsub.f32 %v2583_v37, %v2612_v32  ;;  %614 = vmatpush.msrb.mxu0 %v2472_v55  ;;  %v2117_v55 = vmov 0.0  }
  0x74   : > { %3284 = vst [vmem:[#allocation76_spill] sm:$0xff] %v2577_v61  ;;  %v2628_v61 = vand.u32 4294901760, %v2599_v52  ;;  %v2647_v48 = vsub.f32 %v304_v15, %v2617_v29  ;;  %633 = vmatpush.msrb.mxu1 %v2260_v5  ;;  %v2663_v15 = vsub.f32 %v303_v24, %v2633_v27  ;;  %v2676_v5 = vand.u32 4294901760, %v301_v4  ;;  %v300_v24 = vld [vmem:[#allocation7 + $0x80] sm:$0xff]  ;;  %688 = vmatpush.msrb.mxu2 %v2617_v29 }
  0x75   : > { %3285 = vst [vmem:[#allocation77_spill] sm:$0xff] %v2594_v12  ;;  %v2639_v12 = vand.u32 4294901760, %v739_v34  ;;  %735 = vmatpush.msrb.mxu3 %v2625_v49  ;;  %v2669_v19 = vand.u32 4294901760, %v751_v13  ;;  %v2694_v58 = vand.u32 4294901760, %v300_v24  ;;  %618 = vmatpush.msrb.mxu0 %v2489_v7 }
  0x76   : > { %3286 = vst [vmem:[#allocation78_spill] sm:$0xff] %v2605_v25  ;;  %v757_v34 = vsub.f32 %v2599_v52, %v2628_v61  ;;  %v2658_v25 = vand.u32 4294901760, %v2631_v43  ;;  %635 = vmatpush.msrb.mxu1 %v2262_v9  ;;  %v2674_v45 = vand.u32 4294901760, %v2647_v48  ;;  %v2687_v47 = vand.u32 4294901760, %v2663_v15  ;;  %690 = vmatpush.msrb.mxu2 %v2633_v27 }
  0x77   : > { %3287 = vst [vmem:[#allocation79_spill] sm:$0xff] %v2612_v32  ;;  %v2660_v32 = vand.u32 4294901760, %v302_v33  ;;  %741 = vmatpush.msrb.mxu3 %v2639_v12  ;;  %622 = vmatpush.msrb.mxu0 %v2511_v20 }
  0x78   : > { %3288 = vst [vmem:[#allocation80_spill] sm:$0xff] %v2625_v49  ;;  %v763_v49 = vsub.f32 %v2615_v30, %v2644_v3  ;;  %637 = vmatpush.msrb.mxu1 %v2264_v10  ;;  %v2682_v13 = vand.u32 4294901760, %v757_v34  ;;  %v2703_v10 = vsub.f32 %v301_v4, %v2676_v5  ;;  %v2720_v4 = vsub.f32 %v300_v24, %v2694_v58 }
  0x79   : > { %3289 = vst [vmem:[#allocation81_spill] sm:$0xff] %v2628_v61  ;;  %747 = vmatpush.msrb.mxu3 %v2651_v40  ;;  %v2690_v9 = vsub.f32 %v302_v33, %v2660_v32  ;;  %v316_v33 = vld [vmem:[%s2241_s9] sm:$0xff]  ;;  %692 = vmatpush.msrb.mxu2 %v2660_v32 }
  0x7a   : > { %3290 = vst [vmem:[#allocation82_spill] sm:$0xff] %v2639_v12  ;;  %v769_v12 = vsub.f32 %v2631_v43, %v2658_v25  ;;  %639 = vmatpush.msrb.mxu1 %v2266_v11  ;;  %v2698_v34 = vand.u32 4294901760, %v763_v49  ;;  %v781_v49 = vsub.f32 %v2663_v15, %v2687_v47  ;;  %v2729_v6 = vand.u32 4294901760, %v316_v33  ;;  %361 = vmatmul.f32.vlgmr.msra.gmra.mxu0 %v2117_v55 }
  0x7b   : > { %3291 = vst [vmem:[#allocation83_spill] sm:$0xff] %v2644_v3  ;;  %753 = vmatpush.msrb.mxu3 %v2669_v19  ;;  %694 = vmatpush.msrb.mxu2 %v2676_v5 }
  0x7c   : > { %3292 = vst [vmem:[#allocation84_spill] sm:$0xff] %v2647_v48  ;;  %641 = vmatpush.msrb.mxu1 %v2279_v17  ;;  %v2710_v0 = vand.u32 4294901760, %v769_v12  ;;  %v2727_v12 = vand.u32 4294901760, %v2703_v10  ;;  %v2735_v24 = vand.u32 4294901760, %v781_v49  ;;  %v2749_v49 = vsub.f32 %v316_v33, %v2729_v6  ;;  %809 = vmatpush.msra.mxu0 %v2444_v56  ;;  %v3310_v56 = vld [vmem:[#allocation64_spill] sm:$0xff] }
  0x7d   : > { %3293 = vst [vmem:[#allocation85_spill] sm:$0xff] %v2651_v40  ;;  %v775_v40 = vsub.f32 %v2647_v48, %v2674_v45  ;;  %759 = vmatpush.msrb.mxu3 %v2682_v13  ;;  %516 = vmatmul.f32.vlgmr.msra.gmra.mxu2 %v2117_v55 }
  0x7e   : > { %3294 = vst [vmem:[#allocation86_spill] sm:$0xff] %v2658_v25  ;;  %643 = vmatpush.msrb.mxu1 %v2287_v21  ;;  %v793_v54 = vsub.f32 %v2703_v10, %v2727_v12  ;;  %v2765_v7 = vand.u32 4294901760, %v2749_v49  ;;  %812 = vmatpush.msra.mxu0 %v2461_v59 }
  0x7f   : > { %3295 = vst [vmem:[#allocation87_spill] sm:$0xff] %v2663_v15  ;;  %765 = vmatpush.msrb.mxu3 %v2698_v34  ;;  %696 = vmatpush.msrb.mxu2 %v2694_v58 }
  0x80   : > { %3296 = vst [vmem:[#allocation88_spill] sm:$0xff] %v2669_v19  ;;  %v2715_v19 = vand.u32 4294901760, %v2690_v9  ;;  %645 = vmatpush.msrb.mxu1 %v2307_v28  ;;  %v2762_v33 = vand.u32 4294901760, %v793_v54  ;;  %v700_v54 = vsub.f32 %v2749_v49, %v2765_v7  ;;  %555 = vmatmul.f32.vlgmr.msra.gmra.mxu3 %v2117_v55 }
  0x81   : > { %3297 = vst [vmem:[#allocation89_spill] sm:$0xff] %v2674_v45  ;;  %771 = vmatpush.msrb.mxu3 %v2710_v0  ;;  %815 = vmatpush.msra.mxu0 %v2492_v53 }
  0x82   : > { %3298 = vst [vmem:[#allocation90_spill] sm:$0xff] %v2682_v13  ;;  %v2724_v13 = vand.u32 4294901760, %v775_v40  ;;  %647 = vmatpush.msrb.mxu1 %v2324_v35  ;;  %v2742_v40 = vand.u32 4294901760, %v2720_v4  ;;  %903 = vmatpush.msra.mxu2 %v3310_v56  ;;  %v2784_v59 = vand.u32 4294901760, %v700_v54  ;;  %v3313_v56 = vld [vmem:[#allocation69_spill] sm:$0xff]  ;;  %v3314_v54 = vld [vmem:[#allocation70_spill] sm:$0xff] }
  0x83   : > { %3299 = vst [vmem:[#allocation91_spill] sm:$0xff] %v2687_v47  ;;  %462 = vmatmul.f32.vlgmr.msra.gmra.mxu1 %v2117_v55  ;;  %818 = vmatpush.msra.mxu0 %v2502_v60 }
  0x84   : > { %3300 = vst [vmem:[#allocation92_spill] sm:$0xff] %v2690_v9  ;;  %777 = vmatpush.msrb.mxu3 %v2724_v13  ;;  %649 = vmatpush.msrb.mxu1 %v2341_v41 }
  0x85   : > { %3301 = vst [vmem:[#allocation93_spill] sm:$0xff] %v2698_v34  ;;  %v787_v34 = vsub.f32 %v2690_v9, %v2715_v19  ;;  %821 = vmatpush.msra.mxu0 %v2531_v26  ;;  %702 = vmatmul.f32.vlgmr.msrb.gmra.mxu2 %v2784_v59 }
  0x86   : > { %3302 = vst [vmem:[#allocation94_spill] sm:$0xff] %v2703_v10  ;;  %783 = vmatpush.msrb.mxu3 %v2735_v24  ;;  %651 = vmatpush.msrb.mxu1 %v2366_v51 }
  0x87   : > { %3303 = vst [vmem:[#allocation95_spill] sm:$0xff] %v2710_v0  ;;  %v2755_v0 = vand.u32 4294901760, %v787_v34  ;;  %824 = vmatpush.msra.mxu0 %v2547_v44 }
  0x88   : > { %3304 = vst [vmem:[#allocation96_spill] sm:$0xff] %v2715_v19  ;;  %653 = vmatpush.msrb.mxu1 %v2382_v57  ;;  %624 = vmatmul.f32.vlgmr.msrb.gmra.mxu0 %v2117_v55 }
  0x89   : > { %3305 = vst [vmem:[#allocation97_spill] sm:$0xff] %v2720_v4  ;;  %789 = vmatpush.msrb.mxu3 %v2755_v0  ;;  %827 = vmatpush.msra.mxu0 %v2556_v18 }
  0x8a   : > { %3306 = vst [vmem:[#allocation98_spill] sm:$0xff] %v2724_v13  ;;  %v799_v13 = vsub.f32 %v2720_v4, %v2742_v40  ;;  %655 = vmatpush.msrb.mxu1 %v2395_v63 }
  0x8b   : > { %3307 = vst [vmem:[#allocation99_spill] sm:$0xff] %v2727_v12  ;;  %795 = vmatpush.msrb.mxu3 %v2762_v33  ;;  %830 = vmatpush.msra.mxu0 %v2583_v37 }
  0x8c   : > { %3308 = vst [vmem:[#allocation100_spill] sm:$0xff] %v2742_v40  ;;  %v2772_v34 = vand.u32 4294901760, %v799_v13  ;;  %v3312_v13 = vld [vmem:[#allocation66_spill] sm:$0xff] }
  0x8d   : > { %3309 = vst [vmem:[#allocation101_spill] sm:$0xff] %v2755_v0  ;;  %v3311_v0 = vld [vmem:[#allocation51_spill] sm:$0xff]  ;;  %907 = vmatpush.msra.mxu2 %v3312_v13  ;;  %833 = vmatpush.msra.mxu0 %v2599_v52 }
  0x8e   : > { %657 = vmatpush.msrb.mxu1 %v3311_v0  ;;  %801 = vmatpush.msrb.mxu3 %v2772_v34 }
  0x8f   : > { %911 = vmatpush.msra.mxu2 %v3313_v56  ;;  %803 = vmatmul.f32.vlgmr.msrb.gmra.mxu3 %v2729_v6  ;;  %v3315_v56 = vld [vmem:[#allocation74_spill] sm:$0xff] }
  0x90   : > { %970 = vmatpush.msra.mxu3 %v2408_v8  ;;  %659 = vmatpush.msrb.mxu1 %v2431_v39 }
  0x91   : > { %915 = vmatpush.msra.mxu2 %v3314_v54  ;;  %661 = vmatmul.f32.vlgmr.msrb.gmra.mxu1 %v2117_v55  ;;  %v3316_v55 = vld [vmem:[#allocation79_spill] sm:$0xff] }
  0x92   : > { %862 = vmatpush.msra.mxu1 %v2408_v8  ;;  %972 = vmatpush.msra.mxu3 %v2425_v31 }
  0x93   : > { %919 = vmatpush.msra.mxu2 %v3315_v56  ;;  %836 = vmatpush.msra.mxu0 %v2615_v30 }
  0x94   : > { %864 = vmatpush.msra.mxu1 %v2425_v31  ;;  %974 = vmatpush.msra.mxu3 %v2456_v46 }
  0x95   : > { %923 = vmatpush.msra.mxu2 %v2580_v62  ;;  %839 = vmatpush.msra.mxu0 %v2631_v43 }
  0x96   : > { %866 = vmatpush.msra.mxu1 %v2456_v46  ;;  %976 = vmatpush.msra.mxu3 %v2463_v36 }
  0x97   : > { %927 = vmatpush.msra.mxu2 %v2590_v16  ;;  %842 = vmatpush.msra.mxu0 %v2647_v48  ;;  %v3350_v48 = vld [vmem:[#allocation68_spill] sm:$0xff] }
  0x98   : > { %868 = vmatpush.msra.mxu1 %v2463_v36  ;;  %978 = vmatpush.msra.mxu3 %v2494_v50 }
  0x99   : > { %931 = vmatpush.msra.mxu2 %v3316_v55  ;;  %845 = vmatpush.msra.mxu0 %v2663_v15  ;;  %v3327_v15 = vld [vmem:[#allocation35_spill] sm:$0xff] }
  0x9a   : > { %870 = vmatpush.msra.mxu1 %v2494_v50  ;;  %980 = vmatpush.msra.mxu3 %v2513_v1 }
  0x9b   : > { %935 = vmatpush.msra.mxu2 %v2628_v61  ;;  %848 = vmatpush.msra.mxu0 %v2690_v9  ;;  %v3324_v9 = vld [vmem:[#allocation23_spill] sm:$0xff] }
  0x9c   : > { %872 = vmatpush.msra.mxu1 %v2513_v1  ;;  %982 = vmatpush.msra.mxu3 %v2519_v38  ;;  %v3353_v61 = vld [vmem:[#allocation71_spill] sm:$0xff] }
  0x9d   : > { %939 = vmatpush.msra.mxu2 %v2644_v3  ;;  %851 = vmatpush.msra.mxu0 %v2703_v10  ;;  %v3322_v10 = vld [vmem:[#allocation22_spill] sm:$0xff]  ;;  %v3329_v3 = vld [vmem:[#allocation37_spill] sm:$0xff] }
  0x9e   : > { %874 = vmatpush.msra.mxu1 %v2519_v38  ;;  %984 = vmatpush.msra.mxu3 %v2549_v14 }
  0x9f   : > { %943 = vmatpush.msra.mxu2 %v2658_v25  ;;  %854 = vmatpush.msra.mxu0 %v2720_v4  ;;  %v3320_v4 = vld [vmem:[#allocation21_spill] sm:$0xff]  ;;  %v3326_v25 = vld [vmem:[#allocation24_spill] sm:$0xff] }
  0xa0   : > { %876 = vmatpush.msra.mxu1 %v2549_v14  ;;  %986 = vmatpush.msra.mxu3 %v2567_v22 }
  0xa1   : > { %947 = vmatpush.msra.mxu2 %v2674_v45  ;;  %857 = vmatmul.f32.vlgmr.msra.gmra.mxu0 %v2749_v49  ;;  %v3317_v45 = vld [vmem:[#allocation16_spill] sm:$0xff] }
  0xa2   : > { %878 = vmatpush.msra.mxu1 %v2567_v22  ;;  %988 = vmatpush.msra.mxu3 %v2585_v23 }
  0xa3   : > { %951 = vmatpush.msra.mxu2 %v2687_v47  ;;  %1008 = vmatpush.msrb.mxu0 %v3317_v45  ;;  %v3318_v47 = vld [vmem:[#allocation17_spill] sm:$0xff] }
  0xa4   : > { %880 = vmatpush.msra.mxu1 %v2585_v23  ;;  %990 = vmatpush.msra.mxu3 %v2601_v2 }
  0xa5   : > { %955 = vmatpush.msra.mxu2 %v2715_v19  ;;  %1010 = vmatpush.msrb.mxu0 %v3318_v47  ;;  %v3319_v19 = vld [vmem:[#allocation18_spill] sm:$0xff] }
  0xa6   : > { %882 = vmatpush.msra.mxu1 %v2601_v2  ;;  %992 = vmatpush.msra.mxu3 %v2617_v29 }
  0xa7   : > { %959 = vmatpush.msra.mxu2 %v2727_v12  ;;  %1012 = vmatpush.msrb.mxu0 %v3319_v19  ;;  %v3321_v12 = vld [vmem:[#allocation19_spill] sm:$0xff] }
  0xa8   : > { %884 = vmatpush.msra.mxu1 %v2617_v29  ;;  %994 = vmatpush.msra.mxu3 %v2633_v27 }
  0xa9   : > { %963 = vmatpush.msra.mxu2 %v2742_v40  ;;  %1014 = vmatpush.msrb.mxu0 %v3321_v12  ;;  %v3323_v40 = vld [vmem:[#allocation20_spill] sm:$0xff] }
  0xaa   : > { %886 = vmatpush.msra.mxu1 %v2633_v27  ;;  %996 = vmatpush.msra.mxu3 %v2660_v32 }
  0xab   : > { %965 = vmatmul.f32.vlgmr.msra.gmra.mxu2 %v2729_v6  ;;  %1016 = vmatpush.msrb.mxu0 %v3323_v40 }
  0xac   : > { %888 = vmatpush.msra.mxu1 %v2660_v32  ;;  %998 = vmatpush.msra.mxu3 %v2676_v5 }
  0xad   : > { %1151 = vmatpush.msrb.mxu2 %v3320_v4  ;;  %v3325_v4 = vld [vmem:[#allocation34_spill] sm:$0xff]  ;;  %1018 = vmatpush.msrb.mxu0 %v2266_v11 }
  0xae   : > { %890 = vmatpush.msra.mxu1 %v2676_v5  ;;  %1000 = vmatpush.msra.mxu3 %v2694_v58 }
  0xaf   : > { %1002 = vmatmul.f32.vlgmr.msra.gmra.mxu3 %v2729_v6  ;;  %1154 = vmatpush.msrb.mxu2 %v3322_v10  ;;  %v3328_v10 = vld [vmem:[#allocation25_spill] sm:$0xff] }
  0xb0   : > { %1204 = vmatpush.msrb.mxu3 %v3317_v45  ;;  %892 = vmatpush.msra.mxu1 %v2694_v58 }
  0xb1   : > { %896 = vmatmul.f32.vlgmr.msra.gmra.mxu1 %v2765_v7  ;;  %1157 = vmatpush.msrb.mxu2 %v3324_v9  ;;  %v3330_v9 = vld [vmem:[#allocation29_spill] sm:$0xff] }
  0xb2   : > { %1053 = vmatpush.msrb.mxu1 %v3325_v4  ;;  %1206 = vmatpush.msrb.mxu3 %v3318_v47  ;;  %v3331_v4 = vld [vmem:[#allocation41_spill] sm:$0xff] }
  0xb3   : > { %1160 = vmatpush.msrb.mxu2 %v3326_v25  ;;  %1020 = vmatpush.msrb.mxu0 %v2279_v17  ;;  %v3332_v25 = vld [vmem:[#allocation31_spill] sm:$0xff] }
  0xb4   : > { %1059 = vmatpush.msrb.mxu1 %v3327_v15  ;;  %1208 = vmatpush.msrb.mxu3 %v3319_v19  ;;  %v3333_v15 = vld [vmem:[#allocation44_spill] sm:$0xff] }
  0xb5   : > { %1163 = vmatpush.msrb.mxu2 %v3328_v10  ;;  %1022 = vmatpush.msrb.mxu0 %v2287_v21  ;;  %v3335_v10 = vld [vmem:[#allocation46_spill] sm:$0xff] }
  0xb6   : > { %1065 = vmatpush.msrb.mxu1 %v3329_v3  ;;  %1210 = vmatpush.msrb.mxu3 %v3321_v12  ;;  %v3334_v3 = vld [vmem:[#allocation33_spill] sm:$0xff] }
  0xb7   : > { %1166 = vmatpush.msrb.mxu2 %v3330_v9  ;;  %1024 = vmatpush.msrb.mxu0 %v2307_v28  ;;  %v3336_v9 = vld [vmem:[#allocation39_spill] sm:$0xff] }
  0xb8   : > { %1071 = vmatpush.msrb.mxu1 %v3331_v4  ;;  %1212 = vmatpush.msrb.mxu3 %v3323_v40  ;;  %v3337_v4 = vld [vmem:[#allocation50_spill] sm:$0xff] }
  0xb9   : > { %1169 = vmatpush.msrb.mxu2 %v3332_v25  ;;  %1026 = vmatpush.msrb.mxu0 %v2324_v35  ;;  %v3338_v25 = vld [vmem:[#allocation42_spill] sm:$0xff] }
  0xba   : > { %1077 = vmatpush.msrb.mxu1 %v3333_v15  ;;  %1214 = vmatpush.msrb.mxu3 %v2266_v11  ;;  %v3339_v15 = vld [vmem:[#allocation53_spill] sm:$0xff] }
  0xbb   : > { %1172 = vmatpush.msrb.mxu2 %v3334_v3  ;;  %1028 = vmatpush.msrb.mxu0 %v2341_v41  ;;  %v3340_v3 = vld [vmem:[#allocation43_spill] sm:$0xff] }
  0xbc   : > { %1083 = vmatpush.msrb.mxu1 %v3335_v10  ;;  %1216 = vmatpush.msrb.mxu3 %v2279_v17  ;;  %v3341_v10 = vld [vmem:[#allocation56_spill] sm:$0xff] }
  0xbd   : > { %1175 = vmatpush.msrb.mxu2 %v3336_v9  ;;  %1030 = vmatpush.msrb.mxu0 %v2366_v51  ;;  %v3342_v9 = vld [vmem:[#allocation48_spill] sm:$0xff] }
  0xbe   : > { %1089 = vmatpush.msrb.mxu1 %v3337_v4  ;;  %1218 = vmatpush.msrb.mxu3 %v2287_v21  ;;  %v3343_v4 = vld [vmem:[#allocation60_spill] sm:$0xff] }
  0xbf   : > { %1178 = vmatpush.msrb.mxu2 %v3338_v25  ;;  %1032 = vmatpush.msrb.mxu0 %v2382_v57  ;;  %v3344_v25 = vld [vmem:[#allocation52_spill] sm:$0xff] }
  0xc0   : > { %1095 = vmatpush.msrb.mxu1 %v3339_v15  ;;  %1220 = vmatpush.msrb.mxu3 %v2307_v28  ;;  %v3345_v15 = vld [vmem:[#allocation63_spill] sm:$0xff] }
  0xc1   : > { %1181 = vmatpush.msrb.mxu2 %v3340_v3  ;;  %1034 = vmatpush.msrb.mxu0 %v2395_v63  ;;  %v3346_v3 = vld [vmem:[#allocation54_spill] sm:$0xff] }
  0xc2   : > { %1101 = vmatpush.msrb.mxu1 %v3341_v10  ;;  %1222 = vmatpush.msrb.mxu3 %v2324_v35  ;;  %v3347_v10 = vld [vmem:[#allocation67_spill] sm:$0xff] }
  0xc3   : > { %1184 = vmatpush.msrb.mxu2 %v3342_v9  ;;  %1036 = vmatpush.msrb.mxu0 %v3311_v0  ;;  %v3348_v9 = vld [vmem:[#allocation26_spill] sm:$0xff] }
  0xc4   : > { %1107 = vmatpush.msrb.mxu1 %v3343_v4  ;;  %1224 = vmatpush.msrb.mxu3 %v2341_v41  ;;  %v3349_v4 = vld [vmem:[#allocation58_spill] sm:$0xff] }
  0xc5   : > { %1187 = vmatpush.msrb.mxu2 %v3344_v25  ;;  %1038 = vmatpush.msrb.mxu0 %v2431_v39  ;;  %v3351_v25 = vld [vmem:[#allocation27_spill] sm:$0xff] }
  0xc6   : > { %1113 = vmatpush.msrb.mxu1 %v3345_v15  ;;  %1226 = vmatpush.msrb.mxu3 %v2366_v51  ;;  %v3352_v15 = vld [vmem:[#allocation62_spill] sm:$0xff] }
  0xc7   : > { %1190 = vmatpush.msrb.mxu2 %v3346_v3  ;;  %1245 = vmatpush.msra.mxu0 %v3348_v9  ;;  %v3354_v3 = vld [vmem:[#allocation28_spill] sm:$0xff]  ;;  %v3356_v9 = vld [vmem:[#allocation30_spill] sm:$0xff] }
  0xc8   : > { %1119 = vmatpush.msrb.mxu1 %v3347_v10  ;;  %1228 = vmatpush.msrb.mxu3 %v2382_v57  ;;  %v3355_v10 = vld [vmem:[#allocation73_spill] sm:$0xff] }
  0xc9   : > { %1193 = vmatpush.msrb.mxu2 %v3349_v4  ;;  %1249 = vmatpush.msra.mxu0 %v3351_v25  ;;  %v3358_v4 = vld [vmem:[#allocation76_spill] sm:$0xff] }
  0xca   : > { %1125 = vmatpush.msrb.mxu1 %v3350_v48  ;;  %1230 = vmatpush.msrb.mxu3 %v2395_v63  ;;  %v3357_v48 = vld [vmem:[#allocation72_spill] sm:$0xff] }
  0xcb   : > { %1196 = vmatpush.msrb.mxu2 %v3352_v15  ;;  %1253 = vmatpush.msra.mxu0 %v3354_v3  ;;  %v3359_v25 = vld [vmem:[#allocation32_spill] sm:$0xff]  ;;  %v3362_v3 = vld [vmem:[#allocation77_spill] sm:$0xff] }
  0xcc   : > { %1131 = vmatpush.msrb.mxu1 %v3353_v61  ;;  %1232 = vmatpush.msrb.mxu3 %v3311_v0  ;;  %v3360_v61 = vld [vmem:[#allocation75_spill] sm:$0xff]  ;;  %v3361_v15 = vld [vmem:[#allocation36_spill] sm:$0xff] }
  0xcd   : > { %1349 = vmatpush.msra.mxu2 %v2408_v8  ;;  %1257 = vmatpush.msra.mxu0 %v3356_v9  ;;  %v3364_v9 = vld [vmem:[#allocation78_spill] sm:$0xff] }
  0xce   : > { %1137 = vmatpush.msrb.mxu1 %v3355_v10  ;;  %1234 = vmatpush.msrb.mxu3 %v2431_v39  ;;  %v3363_v10 = vld [vmem:[#allocation38_spill] sm:$0xff] }
  0xcf   : > { %1351 = vmatpush.msra.mxu2 %v2425_v31  ;;  %1261 = vmatpush.msra.mxu0 %v3359_v25  ;;  %v3370_v25 = vld [vmem:[#allocation85_spill] sm:$0xff] }
  0xd0   : > { %1394 = vmatpush.msra.mxu3 %v3357_v48  ;;  %1143 = vmatpush.msrb.mxu1 %v3358_v4  ;;  %v3367_v48 = vld [vmem:[#allocation45_spill] sm:$0xff]  ;;  %v3369_v4 = vld [vmem:[#allocation47_spill] sm:$0xff] }
  0xd1   : > { %1353 = vmatpush.msra.mxu2 %v2456_v46  ;;  %1265 = vmatpush.msra.mxu0 %v3361_v15  ;;  %v3374_v15 = vld [vmem:[#allocation57_spill] sm:$0xff] }
  0xd2   : > { %1312 = vmatpush.msra.mxu1 %v3317_v45  ;;  %1400 = vmatpush.msra.mxu3 %v3360_v61  ;;  %v3365_v45 = vld [vmem:[#allocation40_spill] sm:$0xff] }
  0xd3   : > { %1355 = vmatpush.msra.mxu2 %v2463_v36  ;;  %1269 = vmatpush.msra.mxu0 %v3363_v10  ;;  %v3372_v61 = vld [vmem:[#allocation88_spill] sm:$0xff]  ;;  %v3376_v10 = vld [vmem:[#allocation61_spill] sm:$0xff] }
  0xd4   : > { %1314 = vmatpush.msra.mxu1 %v3318_v47  ;;  %1406 = vmatpush.msra.mxu3 %v3362_v3  ;;  %v3366_v47 = vld [vmem:[#allocation80_spill] sm:$0xff] }
  0xd5   : > { %1357 = vmatpush.msra.mxu2 %v2494_v50  ;;  %1273 = vmatpush.msra.mxu0 %v3365_v45  ;;  %v3381_v45 = vld [vmem:[#allocation101_spill] sm:$0xff] }
  0xd6   : > { %1316 = vmatpush.msra.mxu1 %v3319_v19  ;;  %1412 = vmatpush.msra.mxu3 %v3364_v9  ;;  %v3368_v19 = vld [vmem:[#allocation82_spill] sm:$0xff] }
  0xd7   : > { %1359 = vmatpush.msra.mxu2 %v2513_v1  ;;  %1277 = vmatpush.msra.mxu0 %v3367_v48  ;;  %v3379_v9 = vld [vmem:[#allocation98_spill] sm:$0xff] }
  0xd8   : > { %1318 = vmatpush.msra.mxu1 %v3321_v12  ;;  %1418 = vmatpush.msra.mxu3 %v3366_v47  ;;  %v3371_v12 = vld [vmem:[#allocation49_spill] sm:$0xff] }
  0xd9   : > { %1361 = vmatpush.msra.mxu2 %v2519_v38  ;;  %1281 = vmatpush.msra.mxu0 %v3369_v4 }
  0xda   : > { %1320 = vmatpush.msra.mxu1 %v3323_v40  ;;  %1424 = vmatpush.msra.mxu3 %v3368_v19  ;;  %v317_v40 = vld [vmem:[%s2241_s9 + $0x8] sm:$0xff] }
  0xdb   : > { %1363 = vmatpush.msra.mxu2 %v2549_v14  ;;  %1285 = vmatpush.msra.mxu0 %v3371_v12  ;;  %v2957_v3 = vand.u32 4294901760, %v317_v40 }
  0xdc   : > { %1322 = vmatpush.msra.mxu1 %v2266_v11  ;;  %1430 = vmatpush.msra.mxu3 %v3370_v25  ;;  %v3373_v11 = vld [vmem:[#allocation90_spill] sm:$0xff] }
  0xdd   : > { %1365 = vmatpush.msra.mxu2 %v2567_v22  ;;  %1289 = vmatpush.msra.mxu0 %v2434_v42  ;;  %v3378_v42 = vld [vmem:[#allocation65_spill] sm:$0xff] }
  0xde   : > { %1324 = vmatpush.msra.mxu1 %v2279_v17  ;;  %1436 = vmatpush.msra.mxu3 %v3372_v61  ;;  %v3375_v17 = vld [vmem:[#allocation93_spill] sm:$0xff] }
  0xdf   : > { %1367 = vmatpush.msra.mxu2 %v2585_v23  ;;  %1293 = vmatpush.msra.mxu0 %v3374_v15 }
  0xe0   : > { %1326 = vmatpush.msra.mxu1 %v2287_v21  ;;  %1442 = vmatpush.msra.mxu3 %v3373_v11  ;;  %v3377_v21 = vld [vmem:[#allocation95_spill] sm:$0xff] }
  0xe1   : > { %1369 = vmatpush.msra.mxu2 %v2601_v2  ;;  %1297 = vmatpush.msra.mxu0 %v3376_v10 }
  0xe2   : > { %1328 = vmatpush.msra.mxu1 %v2307_v28  ;;  %1448 = vmatpush.msra.mxu3 %v3375_v17  ;;  %v2968_v28 = vsub.f32 %v317_v40, %v2957_v3 }
  0xe3   : > { %1371 = vmatpush.msra.mxu2 %v2617_v29  ;;  %1301 = vmatpush.msra.mxu0 %v3378_v42 }
  0xe4   : > { %1330 = vmatpush.msra.mxu1 %v2324_v35  ;;  %1454 = vmatpush.msra.mxu3 %v3377_v21  ;;  %v1382_v35 = vand.u32 4294901760, %v2968_v28 }
  0xe5   : > { %1373 = vmatpush.msra.mxu2 %v2633_v27  ;;  %1305 = vmatpush.msra.mxu0 %v2511_v20  ;;  %v3382_v20 = vld [vmem:[#allocation59_spill] sm:$0xff] }
  0xe6   : > { %1332 = vmatpush.msra.mxu1 %v2341_v41  ;;  %1460 = vmatpush.msra.mxu3 %v3379_v9  ;;  %v3380_v41 = vld [vmem:[#allocation55_spill] sm:$0xff] }
  0xe7   : > { %1375 = vmatpush.msra.mxu2 %v2660_v32  ;;  %1044 = vmatmul.f32.vlgmr.msrb.gmra.mxu0 %v2784_v59 }
  0xe8   : > { %1334 = vmatpush.msra.mxu1 %v2366_v51  ;;  %1466 = vmatpush.msra.mxu3 %v2735_v24  ;;  %v1383_v51 = vsub.f32 %v2968_v28, %v1382_v35 }
  0xe9   : > { %1492 = vmatpush.msrb.mxu0 %v3380_v41  ;;  %1377 = vmatpush.msra.mxu2 %v2676_v5 }
  0xea   : > { %1336 = vmatpush.msra.mxu1 %v2382_v57  ;;  %1472 = vmatpush.msra.mxu3 %v3381_v45  ;;  %v3383_v57 = vld [vmem:[#allocation64_spill] sm:$0xff] }
  0xeb   : > { %1199 = vmatmul.f32.vlgmr.msrb.gmra.mxu2 %v2749_v49  ;;  %1495 = vmatpush.msrb.mxu0 %v3382_v20 }
  0xec   : > { %1338 = vmatpush.msra.mxu1 %v2395_v63  ;;  %1379 = vmatpush.msra.mxu2 %v2694_v58  ;;  %v1384_v63 = vand.u32 4294901760, %v1383_v51 }
  0xed   : > { %1478 = vmatpush.msra.mxu3 %v2762_v33  ;;  %1498 = vmatpush.msrb.mxu0 %v2492_v53  ;;  %v3384_v53 = vld [vmem:[#allocation69_spill] sm:$0xff] }
  0xee   : > { %1238 = vmatmul.f32.vlgmr.msrb.gmra.mxu3 %v2765_v7  ;;  %1586 = vmatpush.msrb.mxu2 %v3383_v57 }
  0xef   : > { %1340 = vmatpush.msra.mxu1 %v3311_v0  ;;  %1484 = vmatpush.msra.mxu3 %v2772_v34  ;;  %v3391_v0 = vld [vmem:[#allocation89_spill] sm:$0xff] }
  0xf0   : > { %1145 = vmatmul.f32.vlgmr.msrb.gmra.mxu1 %v2729_v6  ;;  %1501 = vmatpush.msrb.mxu0 %v2502_v60 }
  0xf1   : > { %1590 = vmatpush.msrb.mxu2 %v3312_v13  ;;  %1653 = vmatpush.msrb.mxu3 %v2408_v8 }
  0xf2   : > { %1342 = vmatpush.msra.mxu1 %v2431_v39  ;;  %1504 = vmatpush.msrb.mxu0 %v2531_v26 }
  0xf3   : > { %1594 = vmatpush.msrb.mxu2 %v3384_v53  ;;  %1655 = vmatpush.msrb.mxu3 %v2425_v31 }
  0xf4   : > { %1545 = vmatpush.msrb.mxu1 %v2408_v8  ;;  %1385 = vmatmul.f32.vlgmr.msra.gmra.mxu2 %v1384_v63  ;;  %v3397_v8 = vld [vmem:[#allocation100_spill] sm:$0xff] }
  0xf5   : > { %1507 = vmatpush.msrb.mxu0 %v2547_v44  ;;  %1598 = vmatpush.msrb.mxu2 %v3314_v54 }
  0xf6   : > { %1547 = vmatpush.msrb.mxu1 %v2425_v31  ;;  %1657 = vmatpush.msrb.mxu3 %v2456_v46 }
  0xf7   : > { %1307 = vmatmul.f32.vlgmr.msra.gmra.mxu0 %v2729_v6  ;;  %1486 = vmatmul.f32.vlgmr.msra.gmra.mxu3 %v2957_v3 }
  0xf8   : > { %1510 = vmatpush.msrb.mxu0 %v2556_v18  ;;  %1549 = vmatpush.msrb.mxu1 %v2456_v46  ;;  %v3387_v46 = vld [vmem:[#allocation83_spill] sm:$0xff] }
  0xf9   : > { %1602 = vmatpush.msrb.mxu2 %v3315_v56  ;;  %1659 = vmatpush.msrb.mxu3 %v2463_v36 }
  0xfa   : > { %1344 = vmatmul.f32.vlgmr.msra.gmra.mxu1 %v2729_v6  ;;  %1513 = vmatpush.msrb.mxu0 %v2583_v37  ;;  %v3386_v37 = vld [vmem:[#allocation84_spill] sm:$0xff] }
  0xfb   : > { %1551 = vmatpush.msrb.mxu1 %v2463_v36  ;;  %1606 = vmatpush.msrb.mxu2 %v2580_v62  ;;  %v3385_v36 = vld [vmem:[#allocation81_spill] sm:$0xff]  ;;  %v3389_v62 = vld [vmem:[#allocation86_spill] sm:$0xff]  ;;  %v3395_v6 = vld [vmem:[#allocation96_spill] sm:$0xff] }
  0xfc   : > { %1661 = vmatpush.msrb.mxu3 %v2494_v50  ;;  %1516 = vmatpush.msrb.mxu0 %v2599_v52  ;;  %v3388_v52 = vld [vmem:[#allocation87_spill] sm:$0xff] }
  0xfd   : > { %1553 = vmatpush.msrb.mxu1 %v2494_v50  ;;  %1610 = vmatpush.msrb.mxu2 %v2590_v16 }
  0xfe   : > { %1663 = vmatpush.msrb.mxu3 %v2513_v1  ;;  %1519 = vmatpush.msrb.mxu0 %v2615_v30 }
  0xff   : > { %1555 = vmatpush.msrb.mxu1 %v2513_v1  ;;  %1614 = vmatpush.msrb.mxu2 %v3316_v55  ;;  %v3393_v1 = vld [vmem:[#allocation91_spill] sm:$0xff] }
 0x100   : > { %1665 = vmatpush.msrb.mxu3 %v2519_v38  ;;  %1522 = vmatpush.msrb.mxu0 %v2631_v43  ;;  %v463_v18 = vpop.f32.mrf.mxu1  ;;  %v517_v26 = vpop.f32.mrf.mxu2 }
 0x101   : > { %1557 = vmatpush.msrb.mxu1 %v2519_v38  ;;  %1618 = vmatpush.msrb.mxu2 %v3385_v36  ;;  %v3390_v38 = vld [vmem:[#allocation92_spill] sm:$0xff] }
 0x102   : > { %1667 = vmatpush.msrb.mxu3 %v2549_v14  ;;  %1525 = vmatpush.msrb.mxu0 %v3386_v37 }
 0x103   : > { %1559 = vmatpush.msrb.mxu1 %v2549_v14  ;;  %1622 = vmatpush.msrb.mxu2 %v3387_v46  ;;  %v3392_v14 = vld [vmem:[#allocation94_spill] sm:$0xff]  ;;  %v556_v39 = vpop.f32.mrf.mxu3 }
 0x104   : > { %1669 = vmatpush.msrb.mxu3 %v2567_v22  ;;  %1528 = vmatpush.msrb.mxu0 %v3388_v52 }
 0x105   : > { %1561 = vmatpush.msrb.mxu1 %v2567_v22  ;;  %1626 = vmatpush.msrb.mxu2 %v3389_v62  ;;  %v3394_v22 = vld [vmem:[#allocation97_spill] sm:$0xff] }
 0x106   : > { %1671 = vmatpush.msrb.mxu3 %v2585_v23  ;;  %1531 = vmatpush.msrb.mxu0 %v3390_v38 }
 0x107   : > { %1563 = vmatpush.msrb.mxu1 %v2585_v23  ;;  %1630 = vmatpush.msrb.mxu2 %v3391_v0  ;;  %v3396_v23 = vld [vmem:[#allocation99_spill] sm:$0xff] }
 0x108   : > { %1673 = vmatpush.msrb.mxu3 %v2601_v2  ;;  %1534 = vmatpush.msrb.mxu0 %v3392_v14 }
 0x109   : > { %1565 = vmatpush.msrb.mxu1 %v2601_v2  ;;  %1634 = vmatpush.msrb.mxu2 %v3393_v1  ;;  %v703_v2 = vpop.f32.mrf.mxu2 }
 0x10a   : > { %1675 = vmatpush.msrb.mxu3 %v2617_v29  ;;  %1537 = vmatpush.msrb.mxu0 %v3394_v22 }
 0x10b   : > { %1567 = vmatpush.msrb.mxu1 %v2617_v29  ;;  %1638 = vmatpush.msrb.mxu2 %v3395_v6  ;;  %v362_v29 = vpop.f32.mrf.mxu0 }
 0x10c   : > { %1677 = vmatpush.msrb.mxu3 %v2633_v27  ;;  %1540 = vmatmul.f32.vlgmr.msrb.gmra.mxu0 %v2968_v28 }
 0x10d   : > { %1569 = vmatpush.msrb.mxu1 %v2633_v27  ;;  %1642 = vmatpush.msrb.mxu2 %v3396_v23  ;;  %v464_v27 = vadd.f32 %v463_v18, %v362_v29 }
 0x10e   : > { %1679 = vmatpush.msrb.mxu3 %v2660_v32  ;;  %v662_v59 = vpop.f32.mrf.mxu1 }
 0x10f   : > { %1571 = vmatpush.msrb.mxu1 %v2660_v32  ;;  %1646 = vmatpush.msrb.mxu2 %v3397_v8  ;;  %v518_v31 = vadd.f32 %v517_v26, %v464_v27 }
 0x110   : > { %1681 = vmatpush.msrb.mxu3 %v2676_v5  ;;  %1648 = vmatmul.f32.vlgmr.msrb.gmra.mxu2 %v2957_v3 }
 0x111   : > { %1573 = vmatpush.msrb.mxu1 %v2676_v5  ;;  %v557_v44 = vadd.f32 %v556_v39, %v518_v31 }
 0x112   : > { %1683 = vmatpush.msrb.mxu3 %v2694_v58  ;;  %v804_v50 = vpop.f32.mrf.mxu3 }
 0x113   : > { %1685 = vmatmul.f32.vlgmr.msrb.gmra.mxu3 %v2957_v3  ;;  %1575 = vmatpush.msrb.mxu1 %v2694_v58  ;;  %v625_v56 = vpop.f32.mrf.mxu0 }
 0x114   : > { %1579 = vmatmul.f32.vlgmr.msrb.gmra.mxu1 %v1382_v35  ;;  %v626_v60 = vadd.f32 %v625_v56, %v557_v44 }
 0x116   : > { %v663_v5 = vadd.f32 %v662_v59, %v626_v60 }
 0x118   : > { %v704_v7 = vadd.f32 %v703_v2, %v663_v5 }
 0x11a   : > { %v805_v16 = vadd.f32 %v804_v50, %v704_v7 }
 0x11e   : > { %v858_v32 = vpop.f32.mrf.mxu0 }
 0x11f   : > { %v859_v30 = vadd.f32 %v858_v32, %v805_v16 }
 0x12e   : > { %v897_v43 = vpop.f32.mrf.mxu1  ;;  %v966_v58 = vpop.f32.mrf.mxu2 }
 0x12f   : > { %v898_v24 = vadd.f32 %v897_v43, %v859_v30 }
 0x131   : > { %v967_v49 = vadd.f32 %v966_v58, %v898_v24 }
 0x132   : > { %v1003_v33 = vpop.f32.mrf.mxu3 }
 0x133   : > { %v1004_v34 = vadd.f32 %v1003_v33, %v967_v49 }
 0x135   : > { %1006 = vst [vmem:[%s3067_s18] sm:$0xff] %v1004_v34 }
 0x164   : > { %v1045_v54 = vpop.f32.mrf.mxu0 }
 0x16d   : > { %v1146_v13 = vpop.f32.mrf.mxu1 }
 0x16e   : > { %v1147_v55 = vadd.f32 %v1146_v13, %v1045_v54  ;;  %v1200_v47 = vpop.f32.mrf.mxu2 }
 0x170   : > { %v1201_v48 = vadd.f32 %v1200_v47, %v1147_v55 }
 0x171   : > { %v1239_v19 = vpop.f32.mrf.mxu3 }
 0x172   : > { %v1240_v4 = vadd.f32 %v1239_v19, %v1201_v48 }
 0x174   : > { %v1308_v25 = vpop.f32.mrf.mxu0 }
 0x175   : > { %v1309_v12 = vadd.f32 %v1308_v25, %v1240_v4 }
 0x177   : > { %v1345_v61 = vpop.f32.mrf.mxu1  ;;  %v1386_v11 = vpop.f32.mrf.mxu2 }
 0x178   : > { %v1346_v40 = vadd.f32 %v1345_v61, %v1309_v12 }
 0x17a   : > { %v1387_v15 = vadd.f32 %v1386_v11, %v1346_v40  ;;  %v1487_v3 = vpop.f32.mrf.mxu3 }
 0x17c   : > { %v1488_v10 = vadd.f32 %v1487_v3, %v1387_v15 }
 0x189   : > { %v1541_v17 = vpop.f32.mrf.mxu0 }
 0x18a   : > { %v1542_v21 = vadd.f32 %v1541_v17, %v1488_v10 }
 0x191   : > { %v1580_v42 = vpop.f32.mrf.mxu1 }
 0x192   : > { %v1581_v28 = vadd.f32 %v1580_v42, %v1542_v21 }
 0x193   : > { %v1649_v9 = vpop.f32.mrf.mxu2 }
 0x194   : > { %v1650_v35 = vadd.f32 %v1649_v9, %v1581_v28 }
 0x196   : > { %v1686_v41 = vpop.f32.mrf.mxu3 }
 0x197   : > { %v1687_v45 = vadd.f32 %v1686_v41, %v1650_v35 }
 0x199   : > { %1689 = vst [vmem:[%s3067_s18 + $0x8] sm:$0xff] %v1687_v45 }
 0x19a   : > { %2049 = shalt.err (!%p2046_p13)
}
 0x19b   : > { %1859 = dma.vmem_to_hbm [thread:$0]  (%p2209_p4), %s1707_s21, 256, %s1709_s23, %s1691_s24  }
 0x19c PF: > { %s1720_s10 = sand.u32 1, %s2092_s12   ;;  %p1873_p0 = pnand %p1831_p6, %p2217_p7 }
 0x19d   : > { %s1721_s30 = scalar_lea.sflag [#allocation4], %s1720_s10 }
 0x19e   : > { %p1874_p2 = pneg %p1873_p0 }
 0x1a0   : > { %2087 = dma.done.wait (%p1874_p2), %s1721_s30, 256  }
 0x1a1   : > { %2089 = vsyncadd (%p1874_p2), %s1721_s30, 4294967040  ;;  %s22_s17 = sadd.s32 1, %s2112_s17   ;;  %s3398_s11 = sld [smem:[#allocation15_spill]] }
 0x1a2   : > { %p19_p5 = scmp.ge.s32.totalorder %s22_s17, 4   ;;  %s3399_s15 = sld [smem:[#allocation13_spill]] }
 0x1a3   : > { %s3400_s16 = sld [smem:[#allocation14_spill]]  ;;  %s3401_s12 = smov %s2096_s13 }
 0x1a4   : > { %s3402_s13 = smov %s2100_s14  ;;  %21 = sbr.rel (!%p19_p5) target bundleno = 10 (0xa), region = 94 }
 0x1a7   : > { %s3403_s14 = smov %s3398_s11 }
 0x1a9   :  { %1727 = vsyncpa [#allocation3], 1 }
 0x1aa   :  { %1729 = vsyncpa [#allocation3 + $0x1], 1 }
 0x1ab   :  { %1730 = vsyncpa [#allocation6], 1 }
 0x1ac   :  { %1732 = vsyncpa [#allocation6 + $0x1], 1 }
 0x1ad   :  { %1733 = vsyncpa [#allocation4], 1 }
 0x1ae   :  { %1735 = vsyncpa [#allocation4 + $0x1], 1 }

</bundles_post_ra>
